<compile_context>
chip_gen: v5e
topology: v5e:2x2
jax: 0.10.0
libtpu: 0.0.40
codegen_flags: <defaults>
</compile_context>

<pallas_src>
import math

import jax
import jax.numpy as jnp
from jax.experimental import pallas as pl
from jax.experimental.pallas import tpu as pltpu


# --------------------------------------------------------------------------- #
# Kernel
# --------------------------------------------------------------------------- #
def fused_add_linear_relu_kernel(x_ref, y_ref, wt_ref, b_ref, o_ref):
    # s = x + y                               [TB, In]  (VPU)
    s = x_ref[...] + y_ref[...]
    # acc = s @ W^T  (W^T pre-materialized as [In, Out])   [TB, Out]  (MXU, f32)
    acc = jnp.dot(s, wt_ref[...], preferred_element_type=jnp.float32)
    acc = acc + b_ref[...]                    # bias broadcast from [1, Out]
    o_ref[...] = jnp.maximum(acc, 0.0).astype(o_ref.dtype)   # ReLU


# --------------------------------------------------------------------------- #
# Tile selection helpers
# --------------------------------------------------------------------------- #
def _round_up(x, m):
    return ((x + m - 1) // m) * m


def _default_tb_max():
    """Generation-aware batch-tile cap (conservative for older chips)."""
    try:
        kind = jax.devices()[0].device_kind.lower()
    except Exception:  # pragma: no cover - defensive
        return 4096
    # v5e (16 MiB scoped-VMEM default) and older: keep double-buffered
    # x/y/out comfortably under the default.  v6e/v7x (32 MiB): go bigger.
    if any(tag in kind for tag in ("v2", "v3", "v4", "v5")):
        return 4096
    return 8192


def _select_batch_tile(B, tb_max, min_steps=2):
    """Pick the batch tile TB.

    Invariants (keep if refactoring):
      * TB == B (full extent, legal even when B % 8 != 0), OR
      * TB is a multiple of 8 (sublane) with TB < B; Pallas pads the trailing
        partial block and drops out-of-bounds writes.
    """
    # Small batches: one full-extent block; splitting only adds per-step cost.
    if B <= tb_max and B < max(512, 8 * min_steps):
        return B
    # Aim for >= min_steps grid steps so v7x's two TensorCores both stream,
    # but never exceed tb_max.
    tb = min(tb_max, _round_up(pl.cdiv(B, min_steps), 8))
    return min(tb, B)


# --------------------------------------------------------------------------- #
# Wrapper
# --------------------------------------------------------------------------- #
def pallas_add_linear_relu(x, y, weight, bias, *, tb_max=None):
    """relu((x + y) @ weight.T + bias) with one fused Pallas kernel.

    x, y:    [B, In]   f32
    weight:  [Out, In] f32 (PyTorch nn.Linear layout)
    bias:    [Out]     f32
    """
    B, In = x.shape
    Out, In_w = weight.shape
    assert In == In_w, (In, In_w)
    assert y.shape == (B, In)

    if tb_max is None:
        tb_max = _default_tb_max()

    # One-time, hoisted layout prep (both tiny: 4 KiB weight, 40 B bias).
    w_t = weight.T                                   # [In, Out] — canonical MXU feed
    b2 = bias.reshape(1, Out) if bias.ndim == 1 else bias

    TB = _select_batch_tile(B, tb_max)
    grid = (pl.cdiv(B, TB),)

    cost = pl.CostEstimate(
        flops=2 * B * In * Out,
        transcendentals=0,
        bytes_accessed=4 * (B * (2 * In + Out) + Out * (In + 1)),
    )

    return pl.pallas_call(
        fused_add_linear_relu_kernel,
        out_shape=jax.ShapeDtypeStruct((B, Out), x.dtype),
        grid=grid,
        in_specs=[
            pl.BlockSpec((TB, In), lambda i: (i, 0)),     # x: blocked over batch
            pl.BlockSpec((TB, In), lambda i: (i, 0)),     # y: blocked over batch
            pl.BlockSpec((In, Out), lambda i: (0, 0)),    # W^T: VMEM-resident
            pl.BlockSpec((1, Out), lambda i: (0, 0)),     # bias: VMEM-resident
        ],
        out_specs=pl.BlockSpec((TB, Out), lambda i: (i, 0)),
        compiler_params=pltpu.CompilerParams(
            dimension_semantics=("parallel",),            # shard batch across TCs (v7x)
        ),
        cost_estimate=cost,
    )(x, y, w_t, b2)


# --------------------------------------------------------------------------- #
# Parameter init (mimics torch.nn.Linear default: uniform +/- 1/sqrt(in))
# --------------------------------------------------------------------------- #
def init_linear_params(key, in_features, out_features):
    kw, kb = jax.random.split(key)
    bound = 1.0 / math.sqrt(in_features)
    weight = jax.random.uniform(
        kw, (out_features, in_features), jnp.float32, minval=-bound, maxval=bound
    )
    bias = jax.random.uniform(
        kb, (out_features,), jnp.float32, minval=-bound, maxval=bound
    )
    return weight, bias


if __name__ == "__main__":
    key = jax.random.PRNGKey(0)
    k_x, k_y, k_p = jax.random.split(key, 3)

    B, In, Out = 8, 100, 10
    x = jax.random.normal(k_x, (B, In), dtype=jnp.float32)
    y = jax.random.normal(k_y, (B, In), dtype=jnp.float32)
    weight, bias = init_linear_params(k_p, In, Out)

    out = pallas_add_linear_relu(x, y, weight, bias)
    out = jax.block_until_ready(out)

    # Pure-JAX reference (identical math to the PyTorch module).
    ref = jnp.maximum((x + y) @ weight.T + bias, 0.0)
    assert out.shape == (B, Out)
    assert jnp.allclose(out, ref, atol=1e-5, rtol=1e-5)

    # Also exercise the multi-step (tiled) path with a partial trailing block.
    B2 = 1000
    x2 = jax.random.normal(jax.random.PRNGKey(1), (B2, In), dtype=jnp.float32)
    y2 = jax.random.normal(jax.random.PRNGKey(2), (B2, In), dtype=jnp.float32)
    out2 = jax.block_until_ready(pallas_add_linear_relu(x2, y2, weight, bias))
    ref2 = jnp.maximum((x2 + y2) @ weight.T + bias, 0.0)
    assert jnp.allclose(out2, ref2, atol=1e-5, rtol=1e-5)

    print("KERNEL_OK")
</pallas_src>

<mosaic_0001>
module attributes {stable_mosaic.version = 11 : i64} {
  func.func @fused_add_linear_relu_kernel(%arg0: i32, %arg1: memref<8x100xf32, #tpu.memory_space<vmem>>, %arg2: memref<8x100xf32, #tpu.memory_space<vmem>>, %arg3: memref<100x10xf32, #tpu.memory_space<vmem>>, %arg4: memref<1x10xf32, #tpu.memory_space<vmem>>, %arg5: memref<8x10xf32, #tpu.memory_space<vmem>>) attributes {dimension_semantics = [#tpu.dimension_semantics<parallel>], iteration_bounds = array<i64: 1>, scalar_prefetch = 0 : i64, scratch_operands = 0 : i64, tpu.core_type = #tpu.core_type<tc>, window_params = [{transform_indices = @transform_0, window_bounds = array<i64: 8, 100>}, {transform_indices = @transform_1, window_bounds = array<i64: 8, 100>}, {pipeline_mode = #tpu.pipeline_mode<synchronous>, transform_indices = @transform_2, window_bounds = array<i64: 100, 10>}, {pipeline_mode = #tpu.pipeline_mode<synchronous>, transform_indices = @transform_3, window_bounds = array<i64: 1, 10>}, {transform_indices = @transform_4, window_bounds = array<i64: 8, 10>}]} {
    %c0 = arith.constant 0 : index
    %c0_0 = arith.constant 0 : index
    %0 = vector.load %arg1[%c0, %c0_0] : memref<8x100xf32, #tpu.memory_space<vmem>>, vector<8x100xf32>
    %c0_1 = arith.constant 0 : index
    %c0_2 = arith.constant 0 : index
    %1 = vector.load %arg2[%c0_1, %c0_2] : memref<8x100xf32, #tpu.memory_space<vmem>>, vector<8x100xf32>
    %2 = arith.addf %0, %1 : vector<8x100xf32>
    %c0_3 = arith.constant 0 : index
    %c0_4 = arith.constant 0 : index
    %3 = vector.load %arg3[%c0_3, %c0_4] : memref<100x10xf32, #tpu.memory_space<vmem>>, vector<100x10xf32>
    %cst = arith.constant dense<0.000000e+00> : vector<8x10xf32>
    %4 = tpu.matmul %2, %3, %cst {dimension_numbers = #tpu.dot_dimension_numbers<[1], [0], [0], [1], [0, 0, 1, 1], [], []>} : vector<8x100xf32>, vector<100x10xf32>, vector<8x10xf32> -> vector<8x10xf32>
    %c0_5 = arith.constant 0 : index
    %c0_6 = arith.constant 0 : index
    %5 = vector.load %arg4[%c0_5, %c0_6] : memref<1x10xf32, #tpu.memory_space<vmem>>, vector<1x10xf32>
    %6 = vector.broadcast %5 : vector<1x10xf32> to vector<8x10xf32>
    %7 = arith.addf %4, %6 : vector<8x10xf32>
    %cst_7 = arith.constant 0.000000e+00 : f32
    %8 = vector.broadcast %cst_7 : f32 to vector<8x10xf32>
    %9 = arith.maximumf %7, %8 : vector<8x10xf32>
    %c0_8 = arith.constant 0 : index
    %c0_9 = arith.constant 0 : index
    %10 = vector.load %arg5[%c0_8, %c0_9] : memref<8x10xf32, #tpu.memory_space<vmem>>, vector<8x10xf32>
    tpu.vector_store %arg5[%c0_8, %c0_9], %9 {strides = array<i32>} : memref<8x10xf32, #tpu.memory_space<vmem>>, vector<8x10xf32>,
    return
  }
  func.func @transform_0(%arg0: i32) -> (i32, i32) {
    %c0_i32 = arith.constant 0 : i32
    %c0_i32_0 = arith.constant 0 : i32
    return %arg0, %c0_i32 : i32, i32
  }
  func.func @transform_1(%arg0: i32) -> (i32, i32) {
    %c0_i32 = arith.constant 0 : i32
    %c0_i32_0 = arith.constant 0 : i32
    return %arg0, %c0_i32 : i32, i32
  }
  func.func @transform_2(%arg0: i32) -> (i32, i32) {
    %c0_i32 = arith.constant 0 : i32
    %c0_i32_0 = arith.constant 0 : i32
    %c0_i32_1 = arith.constant 0 : i32
    return %c0_i32, %c0_i32_0 : i32, i32
  }
  func.func @transform_3(%arg0: i32) -> (i32, i32) {
    %c0_i32 = arith.constant 0 : i32
    %c0_i32_0 = arith.constant 0 : i32
    %c0_i32_1 = arith.constant 0 : i32
    return %c0_i32, %c0_i32_0 : i32, i32
  }
  func.func @transform_4(%arg0: i32) -> (i32, i32) {
    %c0_i32 = arith.constant 0 : i32
    %c0_i32_0 = arith.constant 0 : i32
    return %arg0, %c0_i32 : i32, i32
  }
}

</mosaic_0001>

<bundles_post_ra>
// kernel: tpu_custom_call.1
= control target key start
LH: loop header
LB: loop body
LE: loop exit
PB: predicated region body
PF: predicated region fallthrough
CT: control target
= control target key end

     0   :  { %vm42_vm0 = vcmask 1043456   ;;  %s192_s0 = inlined_call_operand.vmem [shape: f32[8,100], index: 0, kind: input, shape index: {}]   ;;  %s193_s1 = inlined_call_operand.vmem [shape: f32[8,100], index: 1, kind: input, shape index: {}]   ;;  %s194_s2 = inlined_call_operand.vmem [shape: f32[100,10], index: 2, kind: input, shape index: {}]   ;;  %s195_s3 = inlined_call_operand.vmem [shape: f32[1,10], index: 3, kind: input, shape index: {}]   ;;  %s196_s4 = inlined_call_operand.hbm [shape: f32[8,10], index: 4, kind: output, shape index: {}]  }
   0x1   :  { %v33_v0 = vld [vmem:[%s194_s2 + $0x60] sm:$0xf]  ;;  %v32_v1 = vld [vmem:[%s194_s2 + $0x58] sm:$0xff]  ;;  %v31_v2 = vld [vmem:[%s194_s2 + $0x50] sm:$0xff] }
   0x2   :  { %85 = vmatpush.msk.msra.mxu0 %vm42_vm0, %v33_v0  ;;  %v30_v3 = vld [vmem:[%s194_s2 + $0x48] sm:$0xff] }
   0x4   :  { %50 = vmatpush.msra.mxu0 %v32_v1 }
   0x6   :  { %51 = vmatpush.msra.mxu0 %v31_v2 }
   0x7   :  { %9 = vsyncpa [#allocation3], 0  ;;  %v29_v4 = vld [vmem:[%s194_s2 + $0x40] sm:$0xff]  ;;  %v28_v5 = vld [vmem:[%s194_s2 + $0x38] sm:$0xff]  ;;  %vm38_vm1 = vcmask 818176   ;;  %s76_s23 = sshll.u32 %s196_s4, 4  ;;  %s77_s23 = int_to_ptr.hbm [resolvable:$true] %s76_s23 }
   0x8   :  { %52 = vmatpush.msra.mxu0 %v30_v3  ;;  %v27_v6 = vld [vmem:[%s194_s2 + $0x30] sm:$0xff]  ;;  %v26_v7 = vld [vmem:[%s194_s2 + $0x28] sm:$0xff]  ;;  %v25_v8 = vld [vmem:[%s194_s2 + $0x20] sm:$0xff]  ;;  %vm67_vm2 = vcmask 80896  }
   0x9   :  { %v24_v9 = vld [vmem:[%s194_s2 + $0x18] sm:$0xff]  ;;  %v23_v10 = vld [vmem:[%s194_s2 + $0x10] sm:$0xff]  ;;  %v18_v11 = vld [vmem:[%s192_s0] sm:$0xff] }
   0xa   :  { %53 = vmatpush.msra.mxu0 %v29_v4  ;;  %v19_v12 = vld [vmem:[%s193_s1] sm:$0xff]  ;;  %v22_v13 = vld [vmem:[%s194_s2 + $0x8] sm:$0xff]  ;;  %s115_s1 = smov [#allocation2]  }
   0xb   :  { %v21_v14 = vld [vmem:[%s194_s2] sm:$0xff]  ;;  %v20_v15 = vadd.f32 %v19_v12, %v18_v11  ;;  %s74_s20 = sshll.u32 %s115_s1, 4  ;;  %s75_s20 = int_to_ptr.vmem [resolvable:$true] %s74_s20 }
   0xc   :  { %54 = vmatpush.msra.mxu0 %v28_v5  ;;  %v88_v16 = vld [vmem:[%s195_s3] ss:$0 sm:$0xff] }
   0xe   :  { %55 = vmatpush.msra.mxu0 %v27_v6 }
  0x10   :  { %56 = vmatpush.msra.mxu0 %v26_v7 }
  0x12   :  { %57 = vmatpush.msra.mxu0 %v25_v8 }
  0x14   :  { %58 = vmatpush.msra.mxu0 %v24_v9 }
  0x16   :  { %59 = vmatpush.msra.mxu0 %v23_v10 }
  0x18   :  { %60 = vmatpush.msra.mxu0 %v22_v13 }
  0x1a   :  { %61 = vmatpush.msra.mxu0 %v21_v14 }
  0x1b   :  { %86 = vmatmul.msk.f32.vlgmr.msra.gmra.mxu0 %vm38_vm1, %v20_v15 }
  0x98   :  { %v63_v17 = vpop.f32.mrf.mxu0 }
  0x99   :  { %v64_v18 = vadd.f32 %v88_v16, %v63_v17 }
  0x9b   :  { %v66_v19 = vmax.f32 %v64_v18, 0.0 }
  0x9d   :  { %68 = vst.msk [vmem:[#allocation2] sm:$0xff] %vm67_vm2, %v66_v19 }
  0x9e   :  { %79 = dma.vmem_to_hbm [thread:$0]  %s75_s20, 128, %s77_s23, [#allocation3]  }
  0x9f   :  { %113 = dma.done.wait [#allocation3], 128  }
  0xa0   :  { %114 = vsyncadd [#allocation3], 4294967168 }
  0xa1   :  { %84 = vsyncpa [#allocation3], 1 }

</bundles_post_ra>
